<compile_context>
chip_gen: v7x
topology: tpu7x:2x2x1
jax: 0.10.0
libtpu: 0.0.40
codegen_flags: <defaults>
</compile_context>

<pallas_src>
import functools

import numpy as np
import jax
import jax.numpy as jnp
from jax.experimental import pallas as pl
from jax.experimental.pallas import tpu as pltpu


# ----------------------------------------------------------------------------
# Cayley-Dickson multiplication table: e_i * e_j = sgn[i, j] * e_{idx[i, j]}
# TODO(synk): the exact sign convention of the original repo's
# HyperLinearFunction is not visible here; standard Cayley-Dickson doubling
# (a,b)(c,d) = (ac - conj(d) b, d a + b conj(c)) is used (octonions for n=8).
# ----------------------------------------------------------------------------
def cd_mult_table(n):
    if n == 1:
        return np.zeros((1, 1), np.int32), np.ones((1, 1), np.int32)
    m = n // 2
    idx0, sgn0 = cd_mult_table(m)

    def conj_sign(j):
        return 1 if j == 0 else -1

    idx = np.zeros((n, n), np.int32)
    sgn = np.zeros((n, n), np.int32)
    for i in range(n):
        for j in range(n):
            a_hi, a = i >= m, i % m
            b_hi, b = j >= m, j % m
            if not a_hi and not b_hi:
                idx[i, j] = idx0[a, b];     sgn[i, j] = sgn0[a, b]
            elif not a_hi and b_hi:
                idx[i, j] = m + idx0[b, a]; sgn[i, j] = sgn0[b, a]
            elif a_hi and not b_hi:
                idx[i, j] = m + idx0[a, b]; sgn[i, j] = sgn0[a, b] * conj_sign(b)
            else:
                idx[i, j] = idx0[b, a];     sgn[i, j] = -sgn0[b, a] * conj_sign(b)
    return idx, sgn


@functools.lru_cache(maxsize=None)
def hyper_tables(n):
    """perm[j, k] = input component feeding output component k via weight j;
       sig[j, k]  = its +-1 sign.  y[:, k] = sum_j sig[j,k] * x[:, perm[j,k]] @ W_j.
    Computed once per n (cached); also returns the raw (idx, sgn) table."""
    idx, sgn = cd_mult_table(n)
    perm = np.zeros((n, n), np.int32)
    sig = np.zeros((n, n), np.int32)
    for i in range(n):
        for j in range(n):
            k = int(idx[i, j])
            perm[j, k] = i
            sig[j, k] = int(sgn[i, j])
    return jnp.asarray(perm), jnp.asarray(sig), idx, sgn


def build_w_big_reference(weights, idx, sgn):
    """Reference-only: explicit (n*in_f, n*out_f) hypercomplex matrix (not used
    by the kernel path)."""
    n = len(weights)
    blocks = [[None] * n for _ in range(n)]
    for i in range(n):
        for j in range(n):
            k = int(idx[i, j])
            blocks[i][k] = float(sgn[i, j]) * weights[j]
    return jnp.concatenate(
        [jnp.concatenate(blocks[i], axis=1) for i in range(n)], axis=0)


# ----------------------------------------------------------------------------
# Parameter packing (do once per parameter update, reuse across forward calls)
# ----------------------------------------------------------------------------
def pack_params(weights, bias, num_components, compute_dtype=jnp.bfloat16):
    n = num_components
    w_stack = jnp.stack([w.astype(compute_dtype) for w in weights], axis=0)
    out_f = w_stack.shape[2]
    if bias is None:
        bias3d = jnp.zeros((n, 1, out_f), jnp.float32)
    else:
        bias3d = bias.astype(jnp.float32).reshape(n, 1, out_f)
    return w_stack, bias3d


# ----------------------------------------------------------------------------
# Pallas kernel: grid = (row tiles, weight component j).  Per step: one unique
# weight component W_j, resident x row slab, 8 small matmuls scattered (with
# sign) into the resident output/accumulator slab.
# ----------------------------------------------------------------------------
def _hyper_linear_kernel(perm_ref, sgn_ref, x_ref, w_ref, b_ref, o_ref, *scratch,
                         n, use_acc_scratch):
    j = pl.program_id(1)
    acc_ref = scratch[0] if use_acc_scratch else o_ref

    @pl.when(j == 0)
    def _init():
        bias = b_ref[...].astype(acc_ref.dtype)                  # (n, 1, out_f)
        acc_ref[...] = jnp.broadcast_to(bias, acc_ref.shape)     # fused bias init

    w = w_ref[0]                                                 # (in_f, out_f)
    for oc in range(n):                                          # static unroll
        ic = perm_ref[j, oc]                                     # SMEM scalar
        s = sgn_ref[j, oc].astype(jnp.float32)                   # +-1
        contrib = jnp.dot(x_ref[ic], w, preferred_element_type=jnp.float32)
        acc_ref[oc] += contrib * s

    if use_acc_scratch:
        @pl.when(j == pl.num_programs(1) - 1)
        def _epilogue():
            o_ref[...] = acc_ref[...].astype(o_ref.dtype)


def _round_up(x, m):
    return ((x + m - 1) // m) * m


def _vmem_need(tm, n, in_f, out_f, cd_bytes, out_bytes, use_acc):
    return (2 * n * tm * in_f * cd_bytes          # x row slab (double-buffered)
            + 2 * in_f * out_f * cd_bytes         # one weight component (dbl-buf)
            + 2 * n * tm * out_f * out_bytes      # output slab (dbl-buf)
            + (n * tm * out_f * 4 if use_acc else 0)   # f32 accumulator
            + 2 * n * out_f * 4)                  # bias


def _choose_tm(M, n, in_f, out_f, cd_bytes, out_bytes, use_acc, vmem_budget):
    """Pick the row tile minimizing an approximate HBM-traffic model
    (activations/outputs once + unique weights once per row tile), subject to
    the VMEM budget.  Multiples of 16 only (bf16 sublane packing)."""
    best, best_cost = None, None
    for c in (16, 32, 64, 128, 256, 512, 1024):
        if _vmem_need(c, n, in_f, out_f, cd_bytes, out_bytes, use_acc) > vmem_budget:
            continue
        Mp = _round_up(M, c)
        cost = (Mp * n * (in_f * cd_bytes + out_f * out_bytes)
                + (Mp // c) * n * in_f * out_f * cd_bytes)
        if best_cost is None or cost <= best_cost:   # ties -> larger tile
            best, best_cost = c, cost
    return best if best is not None else 16


def hyper_linear_matmul(x2d, w_stack, bias3d, perm, sig, *, tm=None,
                        vmem_budget=36 * 1024 * 1024):
    """y = hypercomplex_linear(x2d) with x2d (M, n*in_f) -> (M, n*out_f)."""
    M, C = x2d.shape
    n, in_f, out_f = w_stack.shape
    assert C == n * in_f, "feature dim must equal num_components * in_f"

    compute_dtype = w_stack.dtype
    out_dtype = x2d.dtype
    cd_bytes = jnp.dtype(compute_dtype).itemsize
    out_bytes = jnp.dtype(out_dtype).itemsize
    use_acc = out_dtype != jnp.float32            # f32 outputs accumulate in-place

    if tm is None:
        tm = _choose_tm(M, n, in_f, out_f, cd_bytes, out_bytes, use_acc, vmem_budget)
    Mp = _round_up(M, tm)

    # Component-major layout so the kernel indexes input components on the
    # (untiled) leading axis; pad rows only if needed.
    x_t = jnp.transpose(x2d.reshape(M, n, in_f), (1, 0, 2)).astype(compute_dtype)
    if Mp != M:
        x_t = jnp.pad(x_t, ((0, 0), (0, Mp - M), (0, 0)))

    grid = (Mp // tm, n)     # reduction over weight components is the minor axis
    kernel = functools.partial(_hyper_linear_kernel, n=n, use_acc_scratch=use_acc)
    scratch = [pltpu.VMEM((n, tm, out_f), jnp.float32)] if use_acc else []

    need = _vmem_need(tm, n, in_f, out_f, cd_bytes, out_bytes, use_acc)
    vmem_limit = int(min(max(2 * need, 16 << 20), 48 << 20))

    flops = 2 * Mp * (n * in_f) * (n * out_f)
    bytes_accessed = (Mp * n * in_f * cd_bytes                      # x
                      + (Mp // tm) * n * in_f * out_f * cd_bytes    # unique weights
                      + Mp * n * out_f * out_bytes                  # y
                      + n * out_f * 4)                              # bias
    cost = pl.CostEstimate(flops=flops, transcendentals=0,
                           bytes_accessed=bytes_accessed)

    out = pl.pallas_call(
        kernel,
        out_shape=jax.ShapeDtypeStruct((n, Mp, out_f), out_dtype),
        grid_spec=pltpu.PrefetchScalarGridSpec(
            num_scalar_prefetch=2,          # perm, sig tables -> SMEM
            grid=grid,
            in_specs=[
                # x row slab: resident across the whole weight-component loop.
                pl.BlockSpec((n, tm, in_f), lambda mi, j, _p, _s: (0, mi, 0)),
                # one unique weight component per step (no 8x W_big redundancy).
                pl.BlockSpec((1, in_f, out_f), lambda mi, j, _p, _s: (j, 0, 0)),
                # bias, resident.
                pl.BlockSpec((n, 1, out_f), lambda mi, j, _p, _s: (0, 0, 0)),
            ],
            out_specs=pl.BlockSpec((n, tm, out_f), lambda mi, j, _p, _s: (0, mi, 0)),
            scratch_shapes=scratch,
        ),
        compiler_params=pltpu.CompilerParams(
            # TODO(synk): on v7x, if Mp//tm == 1 one TensorCore idles; split the
            # row tile (or out_f) when enough rows are available.
            dimension_semantics=("parallel", "arbitrary"),
            vmem_limit_bytes=vmem_limit),
        cost_estimate=cost,
    )(perm, sig, x_t, w_stack, bias3d)

    y = out[:, :M, :]                                    # (n, M, out_f)
    return jnp.transpose(y, (1, 0, 2)).reshape(M, n * out_f)


def hyper_linear_forward(x, w_stack, bias3d, perm, sig, **kw):
    """Mirrors HyperLinear.forward: supports 2-D (B, C) and 3-D (T, N, C)."""
    if x.ndim == 3:
        T, N, C = x.shape
        y = hyper_linear_matmul(x.reshape(T * N, C), w_stack, bias3d, perm, sig, **kw)
        return y.reshape(T, N, y.shape[1])
    elif x.ndim == 2:
        return hyper_linear_matmul(x, w_stack, bias3d, perm, sig, **kw)
    raise NotImplementedError


# ----------------------------------------------------------------------------
# Deterministic parameter setup (synthetic stand-in for hypercomplex_init 'he')
# TODO(synk): the repo's chi-distribution 'hypercomplex'/'unitary' init is
# host-side RNG glue; a he-style gaussian stand-in is used here.
# ----------------------------------------------------------------------------
def make_params(key, in_features, out_features, num_components=8):
    in_f = in_features // num_components
    out_f = out_features // num_components
    scale = 1.0 / np.sqrt(num_components * in_f)
    keys = jax.random.split(key, num_components)
    weights = [scale * jax.random.normal(keys[c], (in_f, out_f), jnp.float32)
               for c in range(num_components)]
    bias = jnp.zeros((out_f * num_components,), jnp.float32)   # bias.data.fill_(0)
    return weights, bias


if __name__ == "__main__":
    num_components = 8
    in_features, out_features = 64, 64
    T, N = 2, 8                                   # 3-D input path: (T, N, C)

    key = jax.random.PRNGKey(0)
    kx, kw = jax.random.split(key)
    x = jax.random.normal(kx, (T, N, in_features), jnp.float32)

    weights, bias = make_params(kw, in_features, out_features, num_components)
    perm, sig, idx, sgn = hyper_tables(num_components)

    # Pack once (bf16 weights), reuse across calls; W_big never materialized.
    w_stack, bias3d = pack_params(weights, bias, num_components,
                                  compute_dtype=jnp.bfloat16)

    # Path 1: f32 input -> f32 output, direct accumulation into o_ref.
    out = hyper_linear_forward(x, w_stack, bias3d, perm, sig)
    out = jax.block_until_ready(out)

    # Pure-JAX f32 reference via the explicit block matrix.
    w_big = build_w_big_reference(weights, idx, sgn)
    ref = (x.reshape(T * N, in_features) @ w_big + bias).reshape(T, N, -1)
    np.testing.assert_allclose(np.asarray(out), np.asarray(ref),
                               rtol=2e-2, atol=2e-2)
    assert out.shape == (T, N, out_features)
    assert out.dtype == x.dtype

    # Path 2: bf16 input -> bf16 output (f32 scratch accumulator + cast epilogue).
    out_bf16 = hyper_linear_forward(x.astype(jnp.bfloat16), w_stack, bias3d,
                                    perm, sig)
    out_bf16 = jax.block_until_ready(out_bf16)
    np.testing.assert_allclose(np.asarray(out_bf16.astype(jnp.float32)),
                               np.asarray(ref), rtol=4e-2, atol=4e-2)

    print("KERNEL_OK")
</pallas_src>

<mosaic_0001>
module attributes {stable_mosaic.version = 11 : i64} {
  func.func @_hyper_linear_kernel(%arg0: i32, %arg1: i32, %arg2: memref<8x8xi32, #tpu.memory_space<smem>>, %arg3: memref<8x8xi32, #tpu.memory_space<smem>>, %arg4: memref<8x16x8xbf16, #tpu.memory_space<vmem>>, %arg5: memref<1x8x8xbf16, #tpu.memory_space<vmem>>, %arg6: memref<8x1x8xf32, #tpu.memory_space<vmem>>, %arg7: memref<8x16x8xf32, #tpu.memory_space<vmem>>) attributes {dimension_semantics = [#tpu.dimension_semantics<parallel>, #tpu.dimension_semantics<arbitrary>], iteration_bounds = array<i64: 1, 8>, scalar_prefetch = 2 : i64, scratch_operands = 0 : i64, tpu.core_type = #tpu.core_type<tc>, window_params = [{transform_indices = @transform_0, window_bounds = array<i64: 8, 16, 8>}, {transform_indices = @transform_1, window_bounds = array<i64: 1, 8, 8>}, {pipeline_mode = #tpu.pipeline_mode<synchronous>, transform_indices = @transform_2, window_bounds = array<i64: 8, 1, 8>}, {transform_indices = @transform_3, window_bounds = array<i64: 8, 16, 8>}]} {
    %c0_i32 = arith.constant 0 : i32
    %0 = arith.cmpi eq, %arg1, %c0_i32 : i32
    %1 = arith.extui %0 : i1 to i32
    %c0_i32_0 = arith.constant 0 : i32
    %2 = arith.cmpi ne, %1, %c0_i32_0 : i32
    scf.if %2 {
      %c0_83 = arith.constant 0 : index
      %c0_84 = arith.constant 0 : index
      %c0_85 = arith.constant 0 : index
      %141 = vector.load %arg6[%c0_83, %c0_84, %c0_85] : memref<8x1x8xf32, #tpu.memory_space<vmem>>, vector<8x1x8xf32>
      %142 = vector.shape_cast %141 : vector<8x1x8xf32> to vector<8x1x8xf32>
      %143 = vector.broadcast %142 : vector<8x1x8xf32> to vector<8x16x8xf32>
      %c0_86 = arith.constant 0 : index
      %c0_87 = arith.constant 0 : index
      %c0_88 = arith.constant 0 : index
      %144 = vector.load %arg7[%c0_86, %c0_87, %c0_88] : memref<8x16x8xf32, #tpu.memory_space<vmem>>, vector<8x16x8xf32>
      tpu.vector_store %arg7[%c0_86, %c0_87, %c0_88], %143 {strides = array<i32>} : memref<8x16x8xf32, #tpu.memory_space<vmem>>, vector<8x16x8xf32>,
    } else {
    }
    %c0 = arith.constant 0 : index
    %c0_1 = arith.constant 0 : index
    %c0_2 = arith.constant 0 : index
    %3 = vector.load %arg5[%c0, %c0_1, %c0_2] : memref<1x8x8xbf16, #tpu.memory_space<vmem>>, vector<1x8x8xbf16>
    %4 = vector.shape_cast %3 : vector<1x8x8xbf16> to vector<8x8xbf16>
    %5 = arith.index_cast %arg1 : i32 to index
    %c0_3 = arith.constant 0 : index
    %6 = memref.load %arg2[%5, %c0_3] : memref<8x8xi32, #tpu.memory_space<smem>>
    %7 = arith.index_cast %arg1 : i32 to index
    %c0_4 = arith.constant 0 : index
    %8 = memref.load %arg3[%7, %c0_4] : memref<8x8xi32, #tpu.memory_space<smem>>
    %9 = arith.sitofp %8 : i32 to f32
    %10 = arith.index_cast %6 : i32 to index
    %c0_5 = arith.constant 0 : index
    %c0_6 = arith.constant 0 : index
    %11 = vector.load %arg4[%10, %c0_5, %c0_6] : memref<8x16x8xbf16, #tpu.memory_space<vmem>>, vector<1x16x8xbf16>
    %12 = vector.shape_cast %11 : vector<1x16x8xbf16> to vector<16x8xbf16>
    %cst = arith.constant dense<0.000000e+00> : vector<16x8xf32>
    %13 = tpu.matmul %12, %4, %cst {dimension_numbers = #tpu.dot_dimension_numbers<[1], [0], [0], [1], [0, 0, 1, 1], [], []>} : vector<16x8xbf16>, vector<8x8xbf16>, vector<16x8xf32> -> vector<16x8xf32>
    %c0_7 = arith.constant 0 : index
    %c0_8 = arith.constant 0 : index
    %c0_9 = arith.constant 0 : index
    %14 = vector.load %arg7[%c0_7, %c0_8, %c0_9] : memref<8x16x8xf32, #tpu.memory_space<vmem>>, vector<1x16x8xf32>
    %15 = vector.shape_cast %14 : vector<1x16x8xf32> to vector<16x8xf32>
    %16 = vector.broadcast %9 : f32 to vector<16x8xf32>
    %17 = arith.mulf %13, %16 : vector<16x8xf32>
    %18 = arith.addf %15, %17 : vector<16x8xf32>
    %c0_10 = arith.constant 0 : index
    %c0_11 = arith.constant 0 : index
    %c0_12 = arith.constant 0 : index
    %19 = vector.load %arg7[%c0_10, %c0_11, %c0_12] : memref<8x16x8xf32, #tpu.memory_space<vmem>>, vector<1x16x8xf32>
    %20 = vector.shape_cast %19 : vector<1x16x8xf32> to vector<16x8xf32>
    %21 = vector.shape_cast %18 : vector<16x8xf32> to vector<1x16x8xf32>
    tpu.vector_store %arg7[%c0_10, %c0_11, %c0_12], %21 {strides = array<i32>} : memref<8x16x8xf32, #tpu.memory_space<vmem>>, vector<1x16x8xf32>,
    %22 = arith.index_cast %arg1 : i32 to index
    %c1 = arith.constant 1 : index
    %23 = memref.load %arg2[%22, %c1] : memref<8x8xi32, #tpu.memory_space<smem>>
    %24 = arith.index_cast %arg1 : i32 to index
    %c1_13 = arith.constant 1 : index
    %25 = memref.load %arg3[%24, %c1_13] : memref<8x8xi32, #tpu.memory_space<smem>>
    %26 = arith.sitofp %25 : i32 to f32
    %27 = arith.index_cast %23 : i32 to index
    %c0_14 = arith.constant 0 : index
    %c0_15 = arith.constant 0 : index
    %28 = vector.load %arg4[%27, %c0_14, %c0_15] : memref<8x16x8xbf16, #tpu.memory_space<vmem>>, vector<1x16x8xbf16>
    %29 = vector.shape_cast %28 : vector<1x16x8xbf16> to vector<16x8xbf16>
    %cst_16 = arith.constant dense<0.000000e+00> : vector<16x8xf32>
    %30 = tpu.matmul %29, %4, %cst_16 {dimension_numbers = #tpu.dot_dimension_numbers<[1], [0], [0], [1], [0, 0, 1, 1], [], []>} : vector<16x8xbf16>, vector<8x8xbf16>, vector<16x8xf32> -> vector<16x8xf32>
    %c1_17 = arith.constant 1 : index
    %c0_18 = arith.constant 0 : index
    %c0_19 = arith.constant 0 : index
    %31 = vector.load %arg7[%c1_17, %c0_18, %c0_19] : memref<8x16x8xf32, #tpu.memory_space<vmem>>, vector<1x16x8xf32>
    %32 = vector.shape_cast %31 : vector<1x16x8xf32> to vector<16x8xf32>
    %33 = vector.broadcast %26 : f32 to vector<16x8xf32>
    %34 = arith.mulf %30, %33 : vector<16x8xf32>
    %35 = arith.addf %32, %34 : vector<16x8xf32>
    %c1_20 = arith.constant 1 : index
    %c0_21 = arith.constant 0 : index
    %c0_22 = arith.constant 0 : index
    %36 = vector.load %arg7[%c1_20, %c0_21, %c0_22] : memref<8x16x8xf32, #tpu.memory_space<vmem>>, vector<1x16x8xf32>
    %37 = vector.shape_cast %36 : vector<1x16x8xf32> to vector<16x8xf32>
    %38 = vector.shape_cast %35 : vector<16x8xf32> to vector<1x16x8xf32>
    tpu.vector_store %arg7[%c1_20, %c0_21, %c0_22], %38 {strides = array<i32>} : memref<8x16x8xf32, #tpu.memory_space<vmem>>, vector<1x16x8xf32>,
    %39 = arith.index_cast %arg1 : i32 to index
    %c2 = arith.constant 2 : index
    %40 = memref.load %arg2[%39, %c2] : memref<8x8xi32, #tpu.memory_space<smem>>
    %41 = arith.index_cast %arg1 : i32 to index
    %c2_23 = arith.constant 2 : index
    %42 = memref.load %arg3[%41, %c2_23] : memref<8x8xi32, #tpu.memory_space<smem>>
    %43 = arith.sitofp %42 : i32 to f32
    %44 = arith.index_cast %40 : i32 to index
    %c0_24 = arith.constant 0 : index
    %c0_25 = arith.constant 0 : index
    %45 = vector.load %arg4[%44, %c0_24, %c0_25] : memref<8x16x8xbf16, #tpu.memory_space<vmem>>, vector<1x16x8xbf16>
    %46 = vector.shape_cast %45 : vector<1x16x8xbf16> to vector<16x8xbf16>
    %cst_26 = arith.constant dense<0.000000e+00> : vector<16x8xf32>
    %47 = tpu.matmul %46, %4, %cst_26 {dimension_numbers = #tpu.dot_dimension_numbers<[1], [0], [0], [1], [0, 0, 1, 1], [], []>} : vector<16x8xbf16>, vector<8x8xbf16>, vector<16x8xf32> -> vector<16x8xf32>
    %c2_27 = arith.constant 2 : index
    %c0_28 = arith.constant 0 : index
    %c0_29 = arith.constant 0 : index
    %48 = vector.load %arg7[%c2_27, %c0_28, %c0_29] : memref<8x16x8xf32, #tpu.memory_space<vmem>>, vector<1x16x8xf32>
    %49 = vector.shape_cast %48 : vector<1x16x8xf32> to vector<16x8xf32>
    %50 = vector.broadcast %43 : f32 to vector<16x8xf32>
    %51 = arith.mulf %47, %50 : vector<16x8xf32>
    %52 = arith.addf %49, %51 : vector<16x8xf32>
    %c2_30 = arith.constant 2 : index
    %c0_31 = arith.constant 0 : index
    %c0_32 = arith.constant 0 : index
    %53 = vector.load %arg7[%c2_30, %c0_31, %c0_32] : memref<8x16x8xf32, #tpu.memory_space<vmem>>, vector<1x16x8xf32>
    %54 = vector.shape_cast %53 : vector<1x16x8xf32> to vector<16x8xf32>
    %55 = vector.shape_cast %52 : vector<16x8xf32> to vector<1x16x8xf32>
    tpu.vector_store %arg7[%c2_30, %c0_31, %c0_32], %55 {strides = array<i32>} : memref<8x16x8xf32, #tpu.memory_space<vmem>>, vector<1x16x8xf32>,
    %56 = arith.index_cast %arg1 : i32 to index
    %c3 = arith.constant 3 : index
    %57 = memref.load %arg2[%56, %c3] : memref<8x8xi32, #tpu.memory_space<smem>>
    %58 = arith.index_cast %arg1 : i32 to index
    %c3_33 = arith.constant 3 : index
    %59 = memref.load %arg3[%58, %c3_33] : memref<8x8xi32, #tpu.memory_space<smem>>
    %60 = arith.sitofp %59 : i32 to f32
    %61 = arith.index_cast %57 : i32 to index
    %c0_34 = arith.constant 0 : index
    %c0_35 = arith.constant 0 : index
    %62 = vector.load %arg4[%61, %c0_34, %c0_35] : memref<8x16x8xbf16, #tpu.memory_space<vmem>>, vector<1x16x8xbf16>
    %63 = vector.shape_cast %62 : vector<1x16x8xbf16> to vector<16x8xbf16>
    %cst_36 = arith.constant dense<0.000000e+00> : vector<16x8xf32>
    %64 = tpu.matmul %63, %4, %cst_36 {dimension_numbers = #tpu.dot_dimension_numbers<[1], [0], [0], [1], [0, 0, 1, 1], [], []>} : vector<16x8xbf16>, vector<8x8xbf16>, vector<16x8xf32> -> vector<16x8xf32>
    %c3_37 = arith.constant 3 : index
    %c0_38 = arith.constant 0 : index
    %c0_39 = arith.constant 0 : index
    %65 = vector.load %arg7[%c3_37, %c0_38, %c0_39] : memref<8x16x8xf32, #tpu.memory_space<vmem>>, vector<1x16x8xf32>
    %66 = vector.shape_cast %65 : vector<1x16x8xf32> to vector<16x8xf32>
    %67 = vector.broadcast %60 : f32 to vector<16x8xf32>
    %68 = arith.mulf %64, %67 : vector<16x8xf32>
    %69 = arith.addf %66, %68 : vector<16x8xf32>
    %c3_40 = arith.constant 3 : index
    %c0_41 = arith.constant 0 : index
    %c0_42 = arith.constant 0 : index
    %70 = vector.load %arg7[%c3_40, %c0_41, %c0_42] : memref<8x16x8xf32, #tpu.memory_space<vmem>>, vector<1x16x8xf32>
    %71 = vector.shape_cast %70 : vector<1x16x8xf32> to vector<16x8xf32>
    %72 = vector.shape_cast %69 : vector<16x8xf32> to vector<1x16x8xf32>
    tpu.vector_store %arg7[%c3_40, %c0_41, %c0_42], %72 {strides = array<i32>} : memref<8x16x8xf32, #tpu.memory_space<vmem>>, vector<1x16x8xf32>,
    %73 = arith.index_cast %arg1 : i32 to index
    %c4 = arith.constant 4 : index
    %74 = memref.load %arg2[%73, %c4] : memref<8x8xi32, #tpu.memory_space<smem>>
    %75 = arith.index_cast %arg1 : i32 to index
    %c4_43 = arith.constant 4 : index
    %76 = memref.load %arg3[%75, %c4_43] : memref<8x8xi32, #tpu.memory_space<smem>>
    %77 = arith.sitofp %76 : i32 to f32
    %78 = arith.index_cast %74 : i32 to index
    %c0_44 = arith.constant 0 : index
    %c0_45 = arith.constant 0 : index
    %79 = vector.load %arg4[%78, %c0_44, %c0_45] : memref<8x16x8xbf16, #tpu.memory_space<vmem>>, vector<1x16x8xbf16>
    %80 = vector.shape_cast %79 : vector<1x16x8xbf16> to vector<16x8xbf16>
    %cst_46 = arith.constant dense<0.000000e+00> : vector<16x8xf32>
    %81 = tpu.matmul %80, %4, %cst_46 {dimension_numbers = #tpu.dot_dimension_numbers<[1], [0], [0], [1], [0, 0, 1, 1], [], []>} : vector<16x8xbf16>, vector<8x8xbf16>, vector<16x8xf32> -> vector<16x8xf32>
    %c4_47 = arith.constant 4 : index
    %c0_48 = arith.constant 0 : index
    %c0_49 = arith.constant 0 : index
    %82 = vector.load %arg7[%c4_47, %c0_48, %c0_49] : memref<8x16x8xf32, #tpu.memory_space<vmem>>, vector<1x16x8xf32>
    %83 = vector.shape_cast %82 : vector<1x16x8xf32> to vector<16x8xf32>
    %84 = vector.broadcast %77 : f32 to vector<16x8xf32>
    %85 = arith.mulf %81, %84 : vector<16x8xf32>
    %86 = arith.addf %83, %85 : vector<16x8xf32>
    %c4_50 = arith.constant 4 : index
    %c0_51 = arith.constant 0 : index
    %c0_52 = arith.constant 0 : index
    %87 = vector.load %arg7[%c4_50, %c0_51, %c0_52] : memref<8x16x8xf32, #tpu.memory_space<vmem>>, vector<1x16x8xf32>
    %88 = vector.shape_cast %87 : vector<1x16x8xf32> to vector<16x8xf32>
    %89 = vector.shape_cast %86 : vector<16x8xf32> to vector<1x16x8xf32>
    tpu.vector_store %arg7[%c4_50, %c0_51, %c0_52], %89 {strides = array<i32>} : memref<8x16x8xf32, #tpu.memory_space<vmem>>, vector<1x16x8xf32>,
    %90 = arith.index_cast %arg1 : i32 to index
    %c5 = arith.constant 5 : index
    %91 = memref.load %arg2[%90, %c5] : memref<8x8xi32, #tpu.memory_space<smem>>
    %92 = arith.index_cast %arg1 : i32 to index
    %c5_53 = arith.constant 5 : index
    %93 = memref.load %arg3[%92, %c5_53] : memref<8x8xi32, #tpu.memory_space<smem>>
    %94 = arith.sitofp %93 : i32 to f32
    %95 = arith.index_cast %91 : i32 to index
    %c0_54 = arith.constant 0 : index
    %c0_55 = arith.constant 0 : index
    %96 = vector.load %arg4[%95, %c0_54, %c0_55] : memref<8x16x8xbf16, #tpu.memory_space<vmem>>, vector<1x16x8xbf16>
    %97 = vector.shape_cast %96 : vector<1x16x8xbf16> to vector<16x8xbf16>
    %cst_56 = arith.constant dense<0.000000e+00> : vector<16x8xf32>
    %98 = tpu.matmul %97, %4, %cst_56 {dimension_numbers = #tpu.dot_dimension_numbers<[1], [0], [0], [1], [0, 0, 1, 1], [], []>} : vector<16x8xbf16>, vector<8x8xbf16>, vector<16x8xf32> -> vector<16x8xf32>
    %c5_57 = arith.constant 5 : index
    %c0_58 = arith.constant 0 : index
    %c0_59 = arith.constant 0 : index
    %99 = vector.load %arg7[%c5_57, %c0_58, %c0_59] : memref<8x16x8xf32, #tpu.memory_space<vmem>>, vector<1x16x8xf32>
    %100 = vector.shape_cast %99 : vector<1x16x8xf32> to vector<16x8xf32>
    %101 = vector.broadcast %94 : f32 to vector<16x8xf32>
    %102 = arith.mulf %98, %101 : vector<16x8xf32>
    %103 = arith.addf %100, %102 : vector<16x8xf32>
    %c5_60 = arith.constant 5 : index
    %c0_61 = arith.constant 0 : index
    %c0_62 = arith.constant 0 : index
    %104 = vector.load %arg7[%c5_60, %c0_61, %c0_62] : memref<8x16x8xf32, #tpu.memory_space<vmem>>, vector<1x16x8xf32>
    %105 = vector.shape_cast %104 : vector<1x16x8xf32> to vector<16x8xf32>
    %106 = vector.shape_cast %103 : vector<16x8xf32> to vector<1x16x8xf32>
    tpu.vector_store %arg7[%c5_60, %c0_61, %c0_62], %106 {strides = array<i32>} : memref<8x16x8xf32, #tpu.memory_space<vmem>>, vector<1x16x8xf32>,
    %107 = arith.index_cast %arg1 : i32 to index
    %c6 = arith.constant 6 : index
    %108 = memref.load %arg2[%107, %c6] : memref<8x8xi32, #tpu.memory_space<smem>>
    %109 = arith.index_cast %arg1 : i32 to index
    %c6_63 = arith.constant 6 : index
    %110 = memref.load %arg3[%109, %c6_63] : memref<8x8xi32, #tpu.memory_space<smem>>
    %111 = arith.sitofp %110 : i32 to f32
    %112 = arith.index_cast %108 : i32 to index
    %c0_64 = arith.constant 0 : index
    %c0_65 = arith.constant 0 : index
    %113 = vector.load %arg4[%112, %c0_64, %c0_65] : memref<8x16x8xbf16, #tpu.memory_space<vmem>>, vector<1x16x8xbf16>
    %114 = vector.shape_cast %113 : vector<1x16x8xbf16> to vector<16x8xbf16>
    %cst_66 = arith.constant dense<0.000000e+00> : vector<16x8xf32>
    %115 = tpu.matmul %114, %4, %cst_66 {dimension_numbers = #tpu.dot_dimension_numbers<[1], [0], [0], [1], [0, 0, 1, 1], [], []>} : vector<16x8xbf16>, vector<8x8xbf16>, vector<16x8xf32> -> vector<16x8xf32>
    %c6_67 = arith.constant 6 : index
    %c0_68 = arith.constant 0 : index
    %c0_69 = arith.constant 0 : index
    %116 = vector.load %arg7[%c6_67, %c0_68, %c0_69] : memref<8x16x8xf32, #tpu.memory_space<vmem>>, vector<1x16x8xf32>
    %117 = vector.shape_cast %116 : vector<1x16x8xf32> to vector<16x8xf32>
    %118 = vector.broadcast %111 : f32 to vector<16x8xf32>
    %119 = arith.mulf %115, %118 : vector<16x8xf32>
    %120 = arith.addf %117, %119 : vector<16x8xf32>
    %c6_70 = arith.constant 6 : index
    %c0_71 = arith.constant 0 : index
    %c0_72 = arith.constant 0 : index
    %121 = vector.load %arg7[%c6_70, %c0_71, %c0_72] : memref<8x16x8xf32, #tpu.memory_space<vmem>>, vector<1x16x8xf32>
    %122 = vector.shape_cast %121 : vector<1x16x8xf32> to vector<16x8xf32>
    %123 = vector.shape_cast %120 : vector<16x8xf32> to vector<1x16x8xf32>
    tpu.vector_store %arg7[%c6_70, %c0_71, %c0_72], %123 {strides = array<i32>} : memref<8x16x8xf32, #tpu.memory_space<vmem>>, vector<1x16x8xf32>,
    %124 = arith.index_cast %arg1 : i32 to index
    %c7 = arith.constant 7 : index
    %125 = memref.load %arg2[%124, %c7] : memref<8x8xi32, #tpu.memory_space<smem>>
    %126 = arith.index_cast %arg1 : i32 to index
    %c7_73 = arith.constant 7 : index
    %127 = memref.load %arg3[%126, %c7_73] : memref<8x8xi32, #tpu.memory_space<smem>>
    %128 = arith.sitofp %127 : i32 to f32
    %129 = arith.index_cast %125 : i32 to index
    %c0_74 = arith.constant 0 : index
    %c0_75 = arith.constant 0 : index
    %130 = vector.load %arg4[%129, %c0_74, %c0_75] : memref<8x16x8xbf16, #tpu.memory_space<vmem>>, vector<1x16x8xbf16>
    %131 = vector.shape_cast %130 : vector<1x16x8xbf16> to vector<16x8xbf16>
    %cst_76 = arith.constant dense<0.000000e+00> : vector<16x8xf32>
    %132 = tpu.matmul %131, %4, %cst_76 {dimension_numbers = #tpu.dot_dimension_numbers<[1], [0], [0], [1], [0, 0, 1, 1], [], []>} : vector<16x8xbf16>, vector<8x8xbf16>, vector<16x8xf32> -> vector<16x8xf32>
    %c7_77 = arith.constant 7 : index
    %c0_78 = arith.constant 0 : index
    %c0_79 = arith.constant 0 : index
    %133 = vector.load %arg7[%c7_77, %c0_78, %c0_79] : memref<8x16x8xf32, #tpu.memory_space<vmem>>, vector<1x16x8xf32>
    %134 = vector.shape_cast %133 : vector<1x16x8xf32> to vector<16x8xf32>
    %135 = vector.broadcast %128 : f32 to vector<16x8xf32>
    %136 = arith.mulf %132, %135 : vector<16x8xf32>
    %137 = arith.addf %134, %136 : vector<16x8xf32>
    %c7_80 = arith.constant 7 : index
    %c0_81 = arith.constant 0 : index
    %c0_82 = arith.constant 0 : index
    %138 = vector.load %arg7[%c7_80, %c0_81, %c0_82] : memref<8x16x8xf32, #tpu.memory_space<vmem>>, vector<1x16x8xf32>
    %139 = vector.shape_cast %138 : vector<1x16x8xf32> to vector<16x8xf32>
    %140 = vector.shape_cast %137 : vector<16x8xf32> to vector<1x16x8xf32>
    tpu.vector_store %arg7[%c7_80, %c0_81, %c0_82], %140 {strides = array<i32>} : memref<8x16x8xf32, #tpu.memory_space<vmem>>, vector<1x16x8xf32>,
    return
  }
  func.func @transform_0(%arg0: i32, %arg1: i32, %arg2: memref<8x8xi32, #tpu.memory_space<smem>>, %arg3: memref<8x8xi32, #tpu.memory_space<smem>>) -> (i32, i32, i32) {
    %c0_i32 = arith.constant 0 : i32
    %c0_i32_0 = arith.constant 0 : i32
    %c0_i32_1 = arith.constant 0 : i32
    return %c0_i32, %arg0, %c0_i32_0 : i32, i32, i32
  }
  func.func @transform_1(%arg0: i32, %arg1: i32, %arg2: memref<8x8xi32, #tpu.memory_space<smem>>, %arg3: memref<8x8xi32, #tpu.memory_space<smem>>) -> (i32, i32, i32) {
    %c0_i32 = arith.constant 0 : i32
    %c0_i32_0 = arith.constant 0 : i32
    %c0_i32_1 = arith.constant 0 : i32
    return %arg1, %c0_i32, %c0_i32_0 : i32, i32, i32
  }
  func.func @transform_2(%arg0: i32, %arg1: i32, %arg2: memref<8x8xi32, #tpu.memory_space<smem>>, %arg3: memref<8x8xi32, #tpu.memory_space<smem>>) -> (i32, i32, i32) {
    %c0_i32 = arith.constant 0 : i32
    %c0_i32_0 = arith.constant 0 : i32
    %c0_i32_1 = arith.constant 0 : i32
    %c0_i32_2 = arith.constant 0 : i32
    return %c0_i32, %c0_i32_0, %c0_i32_1 : i32, i32, i32
  }
  func.func @transform_3(%arg0: i32, %arg1: i32, %arg2: memref<8x8xi32, #tpu.memory_space<smem>>, %arg3: memref<8x8xi32, #tpu.memory_space<smem>>) -> (i32, i32, i32) {
    %c0_i32 = arith.constant 0 : i32
    %c0_i32_0 = arith.constant 0 : i32
    %c0_i32_1 = arith.constant 0 : i32
    return %c0_i32, %arg0, %c0_i32_0 : i32, i32, i32
  }
}

</mosaic_0001>

<bundles_post_ra>
// kernel: tpu_custom_call.1
= control target key start
LH: loop header
LB: loop body
LE: loop exit
PB: predicated region body
PF: predicated region fallthrough
CT: control target
= control target key end

     0   :  { %s1572_s0 = inlined_call_operand.vmem [shape: s32[8,8], index: 0, kind: input, shape index: {}]   ;;  %s1573_s2 = inlined_call_operand.vmem [shape: bf16[8,16,8], index: 2, kind: input, shape index: {}]   ;;  %s1574_s3 = inlined_call_operand.vmem [shape: bf16[8,8,8], index: 3, kind: input, shape index: {}]   ;;  %s1575_s4 = inlined_call_operand.vmem [shape: f32[8,1,8], index: 4, kind: input, shape index: {}]   ;;  %s1576_s5 = inlined_call_operand.vmem [shape: f32[8,16,8], index: 5, kind: output, shape index: {}]   ;;  %s1577_s1 = inlined_call_operand.vmem [shape: s32[8,8], index: 1, kind: input, shape index: {}]  }
   0x1   :  { %s10_s20 = sshll.u32 %s1572_s0, 4  ;;  %s14_s23 = sshll.u32 %s1577_s1, 4  ;;  %s11_s20 = int_to_ptr.vmem [resolvable:$true] %s10_s20  ;;  %s15_s23 = int_to_ptr.vmem [resolvable:$true] %s14_s23 }
   0x2   :  { %s1123_s24 = scalar_lea.vmem %s11_s20, 128  ;;  %p1128_p1 = scmp.lt.s32.totalorder %s11_s20, %s11_s20 }
   0x3   :  { %p1124_p0 = scmp.ne.s32.totalorder %s11_s20, %s1123_s24  ;;  %p1129_p2 = scmp.lt.s32.totalorder %s1123_s24, %s1123_s24 }
   0x5   :  { %p1130_p3 = por %p1129_p2, %p1128_p1 }
   0x7   :  { %p1131_p4 = pnand %p1130_p3, %p1124_p0 }
   0x9   :  { %1134 = shalt.err (!%p1131_p4)  }
   0xa   :  { %s1173_s25 = smov [#allocation3]   ;;  %s1135_s26 = scalar_lea.vmem %s15_s23, 128 }
   0xb   :  { %13 = dma.vmem_to_smem %s11_s20, 128, %s1173_s25, [#allocation2] }
   0xc   :  { %p1136_p5 = scmp.ne.s32.totalorder %s15_s23, %s1135_s26  ;;  %p1140_p6 = scmp.lt.s32.totalorder %s15_s23, %s15_s23 }
   0xd   :  { %p1141_p7 = scmp.lt.s32.totalorder %s1135_s26, %s1135_s26 }
   0xf   :  { %p1142_p8 = por %p1141_p7, %p1140_p6 }
  0x11   :  { %p1143_p9 = pnand %p1142_p8, %p1136_p5 }
  0x13   :  { %1146 = shalt.err (!%p1143_p9)  }
  0x14   :  { %s1174_s0 = smov [#allocation4]  }
  0x15   :  { %17 = dma.vmem_to_smem %s15_s23, 128, %s1174_s0, [#allocation2] }
  0x16   :  { %1159 = dma.done.wait [#allocation2], 256 }
  0x17   :  { %1160 = vsyncadd [#allocation2], 4294967040 }
  0x18   :  { %19 = sfence }
  0x19   :  { %s1213_s1 = smov 0   ;;  %s1215_s27 = smov 0  }
  0x1a   :  { %s1217_s28 = smov 0  }
  0x1b LB: > { %s34_s29 = sadd.s32 1, %s1167_s27  ;;  %p939_p10 = scmp.ge.s32.totalorder %s1171_s28, 1  ;;  %s1171_s28 = sphi %s1217_s28, %s25_s28   ;;  %s1167_s27 = sphi %s1215_s27, %s1585_s27   ;;  %s1163_s1 = sphi %s1213_s1, %s1584_s1  }
  0x1c   : > { %p35_p11 = scmp.ge.s32.totalorder %s34_s29, 8  ;;  %p171_p12 = scmp.lt.s32.totalorder %s1171_s28, 9 }
  0x1e   : > { %s1587_s29 = smov (%p35_p11, %s34_s29), 0  ;;  %p172_p13 = pnand %p939_p10, %p171_p12 }
  0x1f   : > { %p205_p0 = scmp.lt.s32.totalorder (!%p172_p13), %s1163_s1, 7  ;;  %p941_p1 = scmp.ne.s32.totalorder (!%p172_p13), %s1163_s1, 0 }
  0x20   : > { %175 = sbr.rel (%p172_p13) target bundleno = 303 (0x12f), region = 32 }
  0x27   : > { %s206_s30 = scalar_select %p205_p0, %s1163_s1, 7 }
  0x28   : > { %219 = sbr.rel (%p941_p1) target bundleno = 49 (0x31), region = 36  ;;  %v942_v0 = vld [vmem:[%s1575_s4] ss:$0 sm:$0xff] (!%p941_p1)  ;;  %vm276_vm0 = vcmask (!%p941_p1), 64512   ;;  %v943_v1 = vld [vmem:[%s1575_s4 + $0x1] ss:$0 sm:$0xff] (!%p941_p1) }
  0x29   : > { %s940_s6 = sshll.u32 %s206_s30, 2  ;;  %277 = vst.msk [vmem:[%s1576_s5] sm:$0xff] (!%p941_p1), %vm276_vm0, %v942_v0  ;;  %278 = vst.msk [vmem:[%s1576_s5 + $0x8] sm:$0xff] (!%p941_p1), %vm276_vm0, %v942_v0  ;;  %v944_v2 = vld [vmem:[%s1575_s4 + $0x2] ss:$0 sm:$0xff] (!%p941_p1) }
  0x2a   : > { %s208_s9 = scalar_lea.vmem %s1574_s3, %s940_s6  ;;  %279 = vst.msk [vmem:[%s1576_s5 + $0x10] sm:$0xff] (!%p941_p1), %vm276_vm0, %v943_v1  ;;  %280 = vst.msk [vmem:[%s1576_s5 + $0x18] sm:$0xff] (!%p941_p1), %vm276_vm0, %v943_v1  ;;  %v945_v3 = vld [vmem:[%s1575_s4 + $0x3] ss:$0 sm:$0xff] (!%p941_p1)  ;;  %v946_v4 = vld [vmem:[%s1575_s4 + $0x4] ss:$0 sm:$0xff] (!%p941_p1) }
  0x2b   : > { %281 = vst.msk [vmem:[%s1576_s5 + $0x20] sm:$0xff] (!%p941_p1), %vm276_vm0, %v944_v2  ;;  %282 = vst.msk [vmem:[%s1576_s5 + $0x28] sm:$0xff] (!%p941_p1), %vm276_vm0, %v944_v2  ;;  %v947_v5 = vld [vmem:[%s1575_s4 + $0x5] ss:$0 sm:$0xff] (!%p941_p1)  ;;  %v948_v6 = vld [vmem:[%s1575_s4 + $0x6] ss:$0 sm:$0xff] (!%p941_p1) }
  0x2c   : > { %283 = vst.msk [vmem:[%s1576_s5 + $0x30] sm:$0xff] (!%p941_p1), %vm276_vm0, %v945_v3  ;;  %284 = vst.msk [vmem:[%s1576_s5 + $0x38] sm:$0xff] (!%p941_p1), %vm276_vm0, %v945_v3  ;;  %v949_v7 = vld [vmem:[%s1575_s4 + $0x7] ss:$0 sm:$0xff] (!%p941_p1) }
  0x2d   : > { %285 = vst.msk [vmem:[%s1576_s5 + $0x40] sm:$0xff] (!%p941_p1), %vm276_vm0, %v946_v4  ;;  %286 = vst.msk [vmem:[%s1576_s5 + $0x48] sm:$0xff] (!%p941_p1), %vm276_vm0, %v946_v4 }
  0x2e   : > { %287 = vst.msk [vmem:[%s1576_s5 + $0x50] sm:$0xff] (!%p941_p1), %vm276_vm0, %v947_v5  ;;  %288 = vst.msk [vmem:[%s1576_s5 + $0x58] sm:$0xff] (!%p941_p1), %vm276_vm0, %v947_v5 }
  0x2f   : > { %289 = vst.msk [vmem:[%s1576_s5 + $0x60] sm:$0xff] %vm276_vm0, %v948_v6  ;;  %290 = vst.msk [vmem:[%s1576_s5 + $0x68] sm:$0xff] %vm276_vm0, %v948_v6 }
  0x30   : > { %291 = vst.msk [vmem:[%s1576_s5 + $0x70] sm:$0xff] %vm276_vm0, %v949_v7  ;;  %292 = vst.msk [vmem:[%s1576_s5 + $0x78] sm:$0xff] %vm276_vm0, %v949_v7 }
  0x31 PF: > { %v293_v8 = vld [vmem:[%s208_s9] sm:$0xf]  ;;  %vm312_vm1 = vcmask 1043456   ;;  %s1328_s14 = sshll.u32 %s1163_s1, 7  ;;  %v1175_v9 = vmov 0.0   ;;  %vm1176_vm2 = vmmov 0  }
  0x32   : > { %1039 = vmatprep.subr.bf16.mxu0 %v1175_v9  ;;  %1045 = vmatprep.subr.bf16.mxu1 %v1175_v9  ;;  %v1332_v10 = vsel %vm312_vm1, %v293_v8, 0  ;;  %s295_s9 = sld [smem:[#allocation3 + %s1328_s14]]  ;;  %s366_s1 = sadd.s32 1, %s1328_s14  ;;  %vm308_vm3 = vcmask 64512   ;;  %v357_v22 = vld [vmem:[%s1576_s5] sm:$0xff]  ;;  %v358_v29 = vld [vmem:[%s1576_s5 + $0x8] sm:$0xff] }
  0x33   : > { %1040 = vmatpush3.bf16.msra.mxu0 %v1332_v10  ;;  %1046 = vmatpush3.bf16.msra.mxu1 %v1332_v10  ;;  %s367_s15 = sld [smem:[#allocation3 + %s366_s1]]  ;;  %s434_s16 = sadd.s32 2, %s1328_s14  ;;  %v959_v26 = vld [vmem:[%s1576_s5 + $0x10] sm:$0xff]  ;;  %v960_v35 = vld [vmem:[%s1576_s5 + $0x18] sm:$0xff] }
  0x34   : > { %1041 = vmatprep.mubr.msk.bf16.mxu0 %vm1176_vm2, %v1175_v9  ;;  %1047 = vmatprep.mubr.msk.bf16.mxu1 %vm1176_vm2, %v1175_v9  ;;  %s435_s17 = sld [smem:[#allocation3 + %s434_s16]]  ;;  %s502_s18 = sadd.s32 3, %s1328_s14  ;;  %v967_v44 = vld [vmem:[%s1576_s5 + $0x20] sm:$0xff]  ;;  %v968_v51 = vld [vmem:[%s1576_s5 + $0x28] sm:$0xff] }
  0x35   : > { %1051 = vmatprep.subr.bf16.mxu0 %v1175_v9  ;;  %1057 = vmatprep.subr.bf16.mxu1 %v1175_v9  ;;  %s503_s19 = sld [smem:[#allocation3 + %s502_s18]]  ;;  %s1578_s20 = sadd.s32 4, %s1328_s14  ;;  %v975_v48 = vld [vmem:[%s1576_s5 + $0x30] sm:$0xff]  ;;  %v976_v57 = vld [vmem:[%s1576_s5 + $0x38] sm:$0xff] }
  0x36   : > { %s571_s21 = sld [smem:[#allocation3 + %s1578_s20]]  ;;  %s1579_s22 = sadd.s32 5, %s1328_s14  ;;  %v983_v2 = vld [vmem:[%s1576_s5 + $0x40] sm:$0xff] }
  0x37   : > { %s639_s23 = sld [smem:[#allocation3 + %s1579_s22]]  ;;  %s1580_s24 = sadd.s32 6, %s1328_s14  ;;  %v991_v6 = vld [vmem:[%s1576_s5 + $0x50] sm:$0xff] }
  0x38   : > { %s1015_s25 = sshll.u32 %s295_s9, 3  ;;  %s707_s26 = sld [smem:[#allocation3 + %s1580_s24]] }
  0x39   : > { %s300_s6 = scalar_lea.vmem %s1573_s2, %s1015_s25  ;;  %s1016_s7 = sshll.u32 %s367_s15, 3 }
  0x3a   : > { %v1115_v11 = vld [vmem:[%s300_s6] sm:$0xff]   ;;  %s372_s11 = scalar_lea.vmem %s1573_s2, %s1016_s7  ;;  %s1017_s12 = sshll.u32 %s435_s17, 3 }
  0x3b   : > { %v1116_v12 = vld [vmem:[%s372_s11] sm:$0xff]   ;;  %s440_s22 = scalar_lea.vmem %s1573_s2, %s1017_s12  ;;  %s1018_s9 = sshll.u32 %s503_s19, 3  ;;  %1042 = vmatmul.mubr.msk.bf16.vlgmr.msra.gmra.mrb[0].mxu0 %vm308_vm3, %v1115_v11 }
  0x3c   : > { %s508_s25 = scalar_lea.vmem %s1573_s2, %s1018_s9  ;;  %s1019_s15 = sshll.u32 %s571_s21, 3  ;;  %1048 = vmatmul.mubr.msk.bf16.vlgmr.msra.gmra.mrb[0].mxu1 %vm308_vm3, %v1116_v12  ;;  %1052 = vmatpush3.bf16.msra.mxu0 %v1332_v10  ;;  %v1117_v13 = vld [vmem:[%s440_s22] sm:$0xff]  }
  0x3d   : > { %s576_s6 = scalar_lea.vmem %s1573_s2, %s1019_s15  ;;  %s1020_s20 = sshll.u32 %s639_s23, 3  ;;  %1058 = vmatpush3.bf16.msra.mxu1 %v1332_v10  ;;  %1053 = vmatprep.mubr.msk.bf16.mxu0 %vm1176_vm2, %v1175_v9  ;;  %v1118_v14 = vld [vmem:[%s508_s25] sm:$0xff]  }
  0x3e   : > { %s644_s24 = scalar_lea.vmem %s1573_s2, %s1020_s20  ;;  %s1021_s8 = sshll.u32 %s707_s26, 3  ;;  %1059 = vmatprep.mubr.msk.bf16.mxu1 %vm1176_vm2, %v1175_v9  ;;  %1063 = vmatprep.subr.bf16.mxu0 %v1175_v9  ;;  %v1119_v15 = vld [vmem:[%s576_s6] sm:$0xff]  }
  0x3f   : > { %s712_s11 = scalar_lea.vmem %s1573_s2, %s1021_s8  ;;  %s774_s23 = sadd.s32 7, %s1328_s14  ;;  %1069 = vmatprep.subr.bf16.mxu1 %v1175_v9  ;;  %v1120_v16 = vld [vmem:[%s644_s24] sm:$0xff]  }
  0x40   : > { %s775_s12 = sld [smem:[#allocation3 + %s774_s23]]  ;;  %v1121_v17 = vld [vmem:[%s712_s11] sm:$0xff]   ;;  %s1581_s8 = sadd.s32 4, %s1328_s14 }
  0x41   : > { %s296_s0 = sld [smem:[#allocation4 + %s1328_s14]] }
  0x42   : > { %s368_s25 = sld [smem:[#allocation4 + %s366_s1]] }
  0x43   : > { %1054 = vmatmul.mubr.msk.bf16.vlgmr.msra.gmra.mrb[4].mxu0 %vm308_vm3, %v1117_v13  ;;  %s1423_s17 = sld [smem:[#allocation4 + %s434_s16]] }
  0x44   : > { %1060 = vmatmul.mubr.msk.bf16.vlgmr.msra.gmra.mrb[4].mxu1 %vm308_vm3, %v1118_v14  ;;  %1064 = vmatpush3.bf16.msra.mxu0 %v1332_v10  ;;  %s1427_s6 = sld [smem:[#allocation4 + %s502_s18]] }
  0x45   : > { %1070 = vmatpush3.bf16.msra.mxu1 %v1332_v10  ;;  %1065 = vmatprep.mubr.msk.bf16.mxu0 %vm1176_vm2, %v1175_v9  ;;  %s1441_s21 = sld [smem:[#allocation4 + %s1581_s8]]  ;;  %s1583_s8 = sadd.s32 6, %s1328_s14 }
  0x46   : > { %s1022_s26 = sshll.u32 %s775_s12, 3  ;;  %1071 = vmatprep.mubr.msk.bf16.mxu1 %vm1176_vm2, %v1175_v9  ;;  %1075 = vmatprep.subr.bf16.mxu0 %v1175_v9  ;;  %s1479_s10 = sld [smem:[#allocation4 + %s1583_s8]] }
  0x47   : > { %s780_s9 = scalar_lea.vmem %s1573_s2, %s1022_s26  ;;  %1081 = vmatprep.subr.bf16.mxu1 %v1175_v9  ;;  %s297_s15 = scvt.s32.f32 %s296_s0 }
  0x48   : > { %v1122_v18 = vld [vmem:[%s780_s9] sm:$0xff]   ;;  %s369_s30 = scvt.s32.f32 %s368_s25  ;;  %s1582_s26 = sadd.s32 5, %s1328_s14 }
  0x49   : > { %v359_v19 = vstv %s297_s15  ;;  %s437_s24 = scvt.s32.f32 %s1423_s17  ;;  %s1449_s22 = sld [smem:[#allocation4 + %s1582_s26]] }
  0x4a   : > { %v427_v20 = vstv %s369_s30  ;;  %s505_s12 = scvt.s32.f32 %s1427_s6  ;;  %s1487_s13 = sld [smem:[#allocation4 + %s774_s23]] }
  0x4b   : > { %1066 = vmatmul.mubr.msk.bf16.vlgmr.msra.gmra.mrb[8].mxu0 %vm308_vm3, %v1119_v15  ;;  %v495_v41 = vstv %s437_s24  ;;  %s573_s24 = scvt.s32.f32 %s1441_s21  ;;  %v992_v15 = vld [vmem:[%s1576_s5 + $0x58] sm:$0xff] }
  0x4c   : > { %1072 = vmatmul.mubr.msk.bf16.vlgmr.msra.gmra.mrb[8].mxu1 %vm308_vm3, %v1120_v16  ;;  %1076 = vmatpush3.bf16.msra.mxu0 %v1332_v10  ;;  %v563_v42 = vstv %s505_s12  ;;  %s709_s16 = scvt.s32.f32 %s1479_s10 }
  0x4d   : > { %1082 = vmatpush3.bf16.msra.mxu1 %v1332_v10  ;;  %1077 = vmatprep.mubr.msk.bf16.mxu0 %vm1176_vm2, %v1175_v9  ;;  %v631_v63 = vstv %s573_s24 }
  0x4e   : > { %1083 = vmatprep.mubr.msk.bf16.mxu1 %vm1176_vm2, %v1175_v9  ;;  %v984_v9 = vld [vmem:[%s1576_s5 + $0x48] sm:$0xff] }
  0x4f   : > { %s641_s26 = scvt.s32.f32 %s1449_s22 }
  0x50   : > { %s777_s24 = scvt.s32.f32 %s1487_s13 }
  0x51   : > { %v699_v0 = vstv %s641_s26 }
  0x53   : > { %1078 = vmatmul.mubr.msk.bf16.vlgmr.msra.gmra.mrb[12].mxu0 %vm308_vm3, %v1121_v17 }
  0x54   : > { %1084 = vmatmul.mubr.msk.bf16.vlgmr.msra.gmra.mrb[12].mxu1 %vm308_vm3, %v1122_v18 }
 0x10e   : > { %v350_v21 = vpop.f32.mrb[0].mxu0 }
 0x10f   : > { %v360_v23 = vmul.f32 %v359_v19, %v350_v21  ;;  %v1043_v24 = vpop.f32.mrb[1].mxu0  ;;  %v417_v25 = vpop.f32.mrb[0].mxu1  ;;  %v767_v21 = vstv %s709_s16 }
 0x110   : > { %v428_v27 = vmul.f32 %v427_v20, %v417_v25  ;;  %v353_v28 = vpop.f32.mrb[2].mxu0  ;;  %v1049_v30 = vpop.f32.mrb[1].mxu1  ;;  %v999_v24 = vld [vmem:[%s1576_s5 + $0x60] sm:$0xff] }
 0x111   : > { %v362_v31 = vadd.f32 %v360_v23, %v357_v22  ;;  %v361_v32 = vmul.f32 %v359_v19, %v353_v28  ;;  %v1044_v33 = vpop.f32.mrb[3].mxu0  ;;  %v420_v34 = vpop.f32.mrb[2].mxu1  ;;  %v835_v22 = vstv %s777_s24  ;;  %v1007_v28 = vld [vmem:[%s1576_s5 + $0x70] sm:$0xff] }
 0x112   : > { %v430_v36 = vadd.f32 %v959_v26, %v428_v27  ;;  %v429_v37 = vmul.f32 %v427_v20, %v420_v34  ;;  %v1050_v38 = vpop.f32.mrb[3].mxu1 }
 0x113   : > { %364 = vst.msk [vmem:[%s1576_s5] sm:$0xff] %vm308_vm3, %v362_v31  ;;  %v363_v39 = vadd.f32 %v361_v32, %v358_v29  ;;  %v1000_v31 = vld [vmem:[%s1576_s5 + $0x68] sm:$0xff] }
 0x114   : > { %961 = vst.msk [vmem:[%s1576_s5 + $0x10] sm:$0xff] %vm308_vm3, %v430_v36  ;;  %v431_v40 = vadd.f32 %v960_v35, %v429_v37  ;;  %v1008_v37 = vld [vmem:[%s1576_s5 + $0x78] sm:$0xff] }
 0x115   : > { %365 = vst.msk [vmem:[%s1576_s5 + $0x8] sm:$0xff] %vm308_vm3, %v363_v39 }
 0x116   : > { %962 = vst.msk [vmem:[%s1576_s5 + $0x18] sm:$0xff] %vm308_vm3, %v431_v40  ;;  %v485_v43 = vpop.f32.mrb[4].mxu0 }
 0x117   : > { %v496_v45 = vmul.f32 %v495_v41, %v485_v43  ;;  %v1055_v46 = vpop.f32.mrb[5].mxu0  ;;  %v553_v47 = vpop.f32.mrb[4].mxu1 }
 0x118   : > { %v564_v49 = vmul.f32 %v563_v42, %v553_v47  ;;  %v488_v50 = vpop.f32.mrb[6].mxu0  ;;  %v1061_v52 = vpop.f32.mrb[5].mxu1 }
 0x119   : > { %v498_v53 = vadd.f32 %v967_v44, %v496_v45  ;;  %v497_v54 = vmul.f32 %v495_v41, %v488_v50  ;;  %v1056_v55 = vpop.f32.mrb[7].mxu0  ;;  %v556_v56 = vpop.f32.mrb[6].mxu1 }
 0x11a   : > { %v566_v58 = vadd.f32 %v975_v48, %v564_v49  ;;  %v565_v59 = vmul.f32 %v563_v42, %v556_v56  ;;  %v1062_v60 = vpop.f32.mrb[7].mxu1 }
 0x11b   : > { %969 = vst.msk [vmem:[%s1576_s5 + $0x20] sm:$0xff] %vm308_vm3, %v498_v53  ;;  %v499_v61 = vadd.f32 %v968_v51, %v497_v54 }
 0x11c   : > { %977 = vst.msk [vmem:[%s1576_s5 + $0x30] sm:$0xff] %vm308_vm3, %v566_v58  ;;  %v567_v62 = vadd.f32 %v976_v57, %v565_v59 }
 0x11d   : > { %970 = vst.msk [vmem:[%s1576_s5 + $0x28] sm:$0xff] %vm308_vm3, %v499_v61 }
 0x11e   : > { %978 = vst.msk [vmem:[%s1576_s5 + $0x38] sm:$0xff] %vm308_vm3, %v567_v62  ;;  %v621_v1 = vpop.f32.mrb[8].mxu0 }
 0x11f   : > { %v632_v3 = vmul.f32 %v631_v63, %v621_v1  ;;  %v1067_v4 = vpop.f32.mrb[9].mxu0  ;;  %v689_v5 = vpop.f32.mrb[8].mxu1 }
 0x120   : > { %v700_v7 = vmul.f32 %v699_v0, %v689_v5  ;;  %v624_v8 = vpop.f32.mrb[10].mxu0  ;;  %v1073_v10 = vpop.f32.mrb[9].mxu1 }
 0x121   : > { %v634_v11 = vadd.f32 %v983_v2, %v632_v3  ;;  %v633_v12 = vmul.f32 %v631_v63, %v624_v8  ;;  %v1068_v13 = vpop.f32.mrb[11].mxu0  ;;  %v692_v14 = vpop.f32.mrb[10].mxu1 }
 0x122   : > { %v702_v16 = vadd.f32 %v991_v6, %v700_v7  ;;  %v701_v17 = vmul.f32 %v699_v0, %v692_v14  ;;  %v1074_v18 = vpop.f32.mrb[11].mxu1 }
 0x123   : > { %985 = vst.msk [vmem:[%s1576_s5 + $0x40] sm:$0xff] %vm308_vm3, %v634_v11  ;;  %v635_v19 = vadd.f32 %v984_v9, %v633_v12 }
 0x124   : > { %993 = vst.msk [vmem:[%s1576_s5 + $0x50] sm:$0xff] %vm308_vm3, %v702_v16  ;;  %v703_v20 = vadd.f32 %v992_v15, %v701_v17 }
 0x125   : > { %986 = vst.msk [vmem:[%s1576_s5 + $0x48] sm:$0xff] %vm308_vm3, %v635_v19 }
 0x126   : > { %994 = vst.msk [vmem:[%s1576_s5 + $0x58] sm:$0xff] %vm308_vm3, %v703_v20  ;;  %v757_v23 = vpop.f32.mrb[12].mxu0 }
 0x127   : > { %v768_v25 = vmul.f32 %v767_v21, %v757_v23  ;;  %v1079_v26 = vpop.f32.mrb[13].mxu0  ;;  %v825_v27 = vpop.f32.mrb[12].mxu1 }
 0x128   : > { %v836_v29 = vmul.f32 %v835_v22, %v825_v27  ;;  %v760_v30 = vpop.f32.mrb[14].mxu0  ;;  %v1085_v32 = vpop.f32.mrb[13].mxu1 }
 0x129   : > { %v770_v33 = vadd.f32 %v999_v24, %v768_v25  ;;  %v769_v34 = vmul.f32 %v767_v21, %v760_v30  ;;  %v1080_v35 = vpop.f32.mrb[15].mxu0  ;;  %v828_v36 = vpop.f32.mrb[14].mxu1 }
 0x12a   : > { %v838_v38 = vadd.f32 %v1007_v28, %v836_v29  ;;  %v837_v39 = vmul.f32 %v835_v22, %v828_v36  ;;  %v1086_v40 = vpop.f32.mrb[15].mxu1 }
 0x12b   : > { %1001 = vst.msk [vmem:[%s1576_s5 + $0x60] sm:$0xff] %vm308_vm3, %v770_v33  ;;  %v771_v41 = vadd.f32 %v1000_v31, %v769_v34 }
 0x12c   : > { %1009 = vst.msk [vmem:[%s1576_s5 + $0x70] sm:$0xff] %vm308_vm3, %v838_v38  ;;  %v839_v42 = vadd.f32 %v1008_v37, %v837_v39 }
 0x12d   : > { %1002 = vst.msk [vmem:[%s1576_s5 + $0x68] sm:$0xff] %vm308_vm3, %v771_v41 }
 0x12e   : > { %1010 = vst.msk [vmem:[%s1576_s5 + $0x78] sm:$0xff] %vm308_vm3, %v839_v42 }
 0x12f PF: > { %s25_s28 = sadd.s32 1, %s1171_s28   ;;  %s1584_s1 = smov %s1167_s27 }
 0x130   : > { %p22_p2 = scmp.ge.s32.totalorder %s25_s28, 10   ;;  %s1585_s27 = smov %s1587_s29 }
 0x132   :  { %24 = sbr.rel (!%p22_p2) target bundleno = 27 (0x1b), region = 84 }

</bundles_post_ra>
